<compile_context>
chip_gen: v5e
topology: v5e:2x2
jax: 0.10.0
libtpu: 0.0.40
codegen_flags: <defaults>
</compile_context>

<pallas_src>
import math
import numpy as np
import jax
import jax.numpy as jnp
from jax import lax
from jax.experimental import pallas as pl
from jax.experimental.pallas import tpu as pltpu

COARSE = 4            # coarse_levels
T = COARSE ** 3       # 64 tokens (4x4x4 partition of the unit cube)
P = 64                # sampled points per token
C = 4                 # RGBA
F = P * C             # flattened per-token features
D = 32                # hidden / token embedding dim
B = 2                 # batch of NeRFs


# ---------------- glue: token bboxes + positional encoding (plain JAX/np) ----
def initialize_token_bboxes(coarse_levels: int = COARSE) -> np.ndarray:
    """4x4x4 grid of bounding boxes (mirror of initialize_tokens())."""
    d = 1.0 / coarse_levels
    boxes = []
    for x1 in np.arange(0, 0.999, d):
        for y1 in np.arange(0, 0.999, d):
            for z1 in np.arange(0, 0.999, d):
                boxes.append([x1, x1 + d, y1, y1 + d, z1, z1 + d])
    return np.asarray(boxes, dtype=np.float32)  # (T, 6)


def bbox_positional_encoding(bboxes: np.ndarray, dim: int) -> jnp.ndarray:
    """Sinusoidal encoding of bbox centers, frequency scaled by log2(bbox size).
    # TODO(synk): exact mip-NeRF-style integrated positional encoding is
    # NotImplemented in the reference module; deterministic sinusoidal PE used.
    """
    centers = (bboxes[:, 0::2] + bboxes[:, 1::2]) * 0.5           # (T, 3)
    shape = bboxes[:, 1::2] - bboxes[:, 0::2]                     # (T, 3)
    n_freq = max(dim // 6, 1)
    freqs = (2.0 ** np.arange(n_freq, dtype=np.float32)) * np.pi  # (n_freq,)
    freq_scale = 1.0 + np.abs(np.log2(shape))                     # (T, 3)
    arg = centers[:, :, None] * freqs[None, None, :] * freq_scale[:, :, None]
    pe = np.concatenate([np.sin(arg), np.cos(arg)], axis=-1)
    pe = pe.reshape(bboxes.shape[0], -1)
    if pe.shape[1] < dim:
        pe = np.pad(pe, ((0, 0), (0, dim - pe.shape[1])))
    return jnp.asarray(pe[:, :dim], dtype=jnp.float32)            # (T, D)


# ---------------- Pallas kernel: per-batch embedding + self-attention --------
def _tokenizer_kernel(x_ref, we_ref, pos_ref, wq_ref, wk_ref, wv_ref, wo_ref,
                      tok_ref, mask_ref, imp_ref):
    t = x_ref.shape[1]                     # tokens per NeRF (static)

    # prefix_layers: linear embedding (bf16 MXU operands, f32 acc) + pos enc
    # (embedding bias already folded into pos host-side; x cast on the VPU).
    x = x_ref[0].astype(jnp.bfloat16)                              # (T, F)
    emb = jnp.dot(x, we_ref[...], preferred_element_type=jnp.float32)
    emb = emb + pos_ref[...]                                       # (T, D) f32

    # core_layers: q/k/v as three lane-aligned (32,32) matmuls; 1/sqrt(D)
    # pre-folded into wq.  All MXU operands bf16, accumulation f32.
    emb_b = emb.astype(jnp.bfloat16)
    q = jnp.dot(emb_b, wq_ref[...], preferred_element_type=jnp.float32)
    k = jnp.dot(emb_b, wk_ref[...], preferred_element_type=jnp.float32)
    v = jnp.dot(emb_b, wv_ref[...], preferred_element_type=jnp.float32)

    # Scores: contract k on its last axis directly (no explicit transpose).
    s = lax.dot_general(q.astype(jnp.bfloat16), k.astype(jnp.bfloat16),
                        dimension_numbers=(((1,), (1,)), ((), ())),
                        preferred_element_type=jnp.float32)        # (T, T)

    # Exact f32 softmax (approx reciprocal broke the row-sum invariant).
    m = jnp.max(s, axis=-1, keepdims=True)
    e = jnp.exp(s - m)
    p = e / jnp.sum(e, axis=-1, keepdims=True)                     # (T, T)

    o = jnp.dot(p.astype(jnp.bfloat16), v.astype(jnp.bfloat16),
                preferred_element_type=jnp.float32)                # (T, D)
    o = jnp.dot(o.astype(jnp.bfloat16), wo_ref[...],
                preferred_element_type=jnp.float32)                # (T, D)

    # suffix_layers: attended tokens, soft partition masks, importance.
    tok_ref[0] = emb + o                                           # (T, D)
    mask_ref[0] = p                                                # (T, T)
    imp_ref[0] = jnp.sum(p, axis=0, keepdims=True) * (1.0 / t)     # (1, T)
    # TODO(synk): coordinate regression per mask, NeRF re-sampling and mask
    # pruning (docstring steps 7-9) need on-the-fly NeRF evaluation, which is
    # NotImplemented in the reference module.


def prepare_params(we, be, pos, wq, wk, wv, wo):
    """One-time parameter folding, hoisted out of the per-call hot path."""
    dh = wq.shape[0]
    return dict(
        we=we.astype(jnp.bfloat16),                                # (F, D)
        pos=(pos + be).astype(jnp.float32),                        # (T, D)
        wq=(wq * (1.0 / math.sqrt(dh))).astype(jnp.bfloat16),      # (D, D)
        wk=wk.astype(jnp.bfloat16),
        wv=wv.astype(jnp.bfloat16),
        wo=wo.astype(jnp.bfloat16),
    )


@jax.jit
def nerf_tokenizer(x, we, pos, wq, wk, wv, wo):
    Bn, Tn, Pn, Cn = x.shape
    Fn = Pn * Cn
    Dh = wq.shape[1]

    xf = x.reshape(Bn, Tn, Fn)      # contiguous reshape, no HBM traffic

    out_shape = (
        jax.ShapeDtypeStruct((Bn, Tn, Dh), jnp.float32),           # tokens
        jax.ShapeDtypeStruct((Bn, Tn, Tn), jnp.float32),           # masks
        jax.ShapeDtypeStruct((Bn, 1, Tn), jnp.float32),            # importance
    )
    grid_spec = pltpu.PrefetchScalarGridSpec(
        num_scalar_prefetch=0,
        grid=(Bn,),                                                # 1 NeRF/step
        in_specs=[
            pl.BlockSpec((1, Tn, Fn), lambda b: (b, 0, 0)),        # x (f32)
            pl.BlockSpec((Fn, Dh), lambda b: (0, 0)),              # we (bf16)
            pl.BlockSpec((Tn, Dh), lambda b: (0, 0)),              # pos+be (f32)
            pl.BlockSpec((Dh, Dh), lambda b: (0, 0)),              # wq*scale
            pl.BlockSpec((Dh, Dh), lambda b: (0, 0)),              # wk
            pl.BlockSpec((Dh, Dh), lambda b: (0, 0)),              # wv
            pl.BlockSpec((Dh, Dh), lambda b: (0, 0)),              # wo
        ],
        out_specs=[
            pl.BlockSpec((1, Tn, Dh), lambda b: (b, 0, 0)),
            pl.BlockSpec((1, Tn, Tn), lambda b: (b, 0, 0)),
            pl.BlockSpec((1, 1, Tn), lambda b: (b, 0, 0)),
        ],
    )

    flops = 2 * Bn * Tn * (Fn * Dh + 3 * Dh * Dh + Dh * Tn + Tn * Dh + Dh * Dh)
    transcendentals = Bn * Tn * Tn
    bytes_accessed = (Bn * Tn * Fn * 4 + Fn * Dh * 2 + Tn * Dh * 4
                      + 4 * Dh * Dh * 2
                      + Bn * Tn * Dh * 4 + Bn * Tn * Tn * 4 + Bn * Tn * 4)

    tokens, masks, importance = pl.pallas_call(
        _tokenizer_kernel,
        out_shape=out_shape,
        grid_spec=grid_spec,
        compiler_params=pltpu.CompilerParams(
            dimension_semantics=("parallel",)),                    # 2 TCs on v7x
        cost_estimate=pl.CostEstimate(
            flops=flops, transcendentals=transcendentals,
            bytes_accessed=bytes_accessed),
    )(xf, we, pos, wq, wk, wv, wo)

    return tokens, masks, importance


if __name__ == "__main__":
    key = jax.random.PRNGKey(0)
    k_x, k_we, k_be, k_q, k_k, k_v, k_o = jax.random.split(key, 7)

    # Synthetic RGBA samples of the NeRF at 64 points per bbox token.
    x = jax.random.uniform(k_x, (B, T, P, C), dtype=jnp.float32)

    # Deterministic parameter init (no checkpoint).
    we = jax.random.normal(k_we, (F, D), dtype=jnp.float32) * (1.0 / math.sqrt(F))
    be = jax.random.normal(k_be, (1, D), dtype=jnp.float32) * 0.02
    wq = jax.random.normal(k_q, (D, D), dtype=jnp.float32) * (1.0 / math.sqrt(D))
    wk = jax.random.normal(k_k, (D, D), dtype=jnp.float32) * (1.0 / math.sqrt(D))
    wv = jax.random.normal(k_v, (D, D), dtype=jnp.float32) * (1.0 / math.sqrt(D))
    wo = jax.random.normal(k_o, (D, D), dtype=jnp.float32) * (1.0 / math.sqrt(D))

    bboxes = initialize_token_bboxes(COARSE)          # (64, 6)
    pos = bbox_positional_encoding(bboxes, D)         # (64, D)

    params = prepare_params(we, be, pos, wq, wk, wv, wo)
    tokens, masks, importance = nerf_tokenizer(
        x, params["we"], params["pos"], params["wq"],
        params["wk"], params["wv"], params["wo"])
    jax.block_until_ready((tokens, masks, importance))

    assert tokens.shape == (B, T, D)
    assert masks.shape == (B, T, T)
    assert importance.shape == (B, 1, T)
    assert bool(jnp.all(jnp.isfinite(tokens)))
    assert bool(jnp.all(masks >= 0.0))
    # attention rows sum to 1 (exact f32 normalization)
    assert bool(jnp.allclose(jnp.sum(masks, axis=-1), 1.0, atol=1e-3))
    # importance = mean attention mass per token, sums to 1 per NeRF
    assert bool(jnp.allclose(jnp.sum(importance, axis=-1), 1.0, atol=1e-3))

    print("KERNEL_OK")
</pallas_src>

<mosaic_0001>
module attributes {stable_mosaic.version = 11 : i64} {
  func.func @_tokenizer_kernel(%arg0: i32, %arg1: memref<1x64x256xf32, #tpu.memory_space<vmem>>, %arg2: memref<256x32xbf16, #tpu.memory_space<vmem>>, %arg3: memref<64x32xf32, #tpu.memory_space<vmem>>, %arg4: memref<32x32xbf16, #tpu.memory_space<vmem>>, %arg5: memref<32x32xbf16, #tpu.memory_space<vmem>>, %arg6: memref<32x32xbf16, #tpu.memory_space<vmem>>, %arg7: memref<32x32xbf16, #tpu.memory_space<vmem>>, %arg8: memref<1x64x32xf32, #tpu.memory_space<vmem>>, %arg9: memref<1x64x64xf32, #tpu.memory_space<vmem>>, %arg10: memref<1x1x64xf32, #tpu.memory_space<vmem>>) attributes {dimension_semantics = [#tpu.dimension_semantics<parallel>], iteration_bounds = array<i64: 2>, scalar_prefetch = 0 : i64, scratch_operands = 0 : i64, tpu.core_type = #tpu.core_type<tc>, window_params = [{transform_indices = @transform_0, window_bounds = array<i64: 1, 64, 256>}, {pipeline_mode = #tpu.pipeline_mode<synchronous>, transform_indices = @transform_1, window_bounds = array<i64: 256, 32>}, {pipeline_mode = #tpu.pipeline_mode<synchronous>, transform_indices = @transform_2, window_bounds = array<i64: 64, 32>}, {pipeline_mode = #tpu.pipeline_mode<synchronous>, transform_indices = @transform_3, window_bounds = array<i64: 32, 32>}, {pipeline_mode = #tpu.pipeline_mode<synchronous>, transform_indices = @transform_4, window_bounds = array<i64: 32, 32>}, {pipeline_mode = #tpu.pipeline_mode<synchronous>, transform_indices = @transform_5, window_bounds = array<i64: 32, 32>}, {pipeline_mode = #tpu.pipeline_mode<synchronous>, transform_indices = @transform_6, window_bounds = array<i64: 32, 32>}, {transform_indices = @transform_7, window_bounds = array<i64: 1, 64, 32>}, {transform_indices = @transform_8, window_bounds = array<i64: 1, 64, 64>}, {transform_indices = @transform_9, window_bounds = array<i64: 1, 1, 64>}]} {
    %c0 = arith.constant 0 : index
    %c0_0 = arith.constant 0 : index
    %c0_1 = arith.constant 0 : index
    %0 = vector.load %arg1[%c0, %c0_0, %c0_1] : memref<1x64x256xf32, #tpu.memory_space<vmem>>, vector<1x64x256xf32>
    %1 = vector.shape_cast %0 : vector<1x64x256xf32> to vector<64x256xf32>
    %2 = arith.truncf %1 : vector<64x256xf32> to vector<64x256xbf16>
    %c0_2 = arith.constant 0 : index
    %c0_3 = arith.constant 0 : index
    %3 = vector.load %arg2[%c0_2, %c0_3] : memref<256x32xbf16, #tpu.memory_space<vmem>>, vector<256x32xbf16>
    %cst = arith.constant dense<0.000000e+00> : vector<64x32xf32>
    %4 = tpu.matmul %2, %3, %cst {dimension_numbers = #tpu.dot_dimension_numbers<[1], [0], [0], [1], [0, 0, 1, 1], [], []>} : vector<64x256xbf16>, vector<256x32xbf16>, vector<64x32xf32> -> vector<64x32xf32>
    %c0_4 = arith.constant 0 : index
    %c0_5 = arith.constant 0 : index
    %5 = vector.load %arg3[%c0_4, %c0_5] : memref<64x32xf32, #tpu.memory_space<vmem>>, vector<64x32xf32>
    %6 = arith.addf %4, %5 : vector<64x32xf32>
    %7 = arith.truncf %6 : vector<64x32xf32> to vector<64x32xbf16>
    %c0_6 = arith.constant 0 : index
    %c0_7 = arith.constant 0 : index
    %8 = vector.load %arg4[%c0_6, %c0_7] : memref<32x32xbf16, #tpu.memory_space<vmem>>, vector<32x32xbf16>
    %cst_8 = arith.constant dense<0.000000e+00> : vector<64x32xf32>
    %9 = tpu.matmul %7, %8, %cst_8 {dimension_numbers = #tpu.dot_dimension_numbers<[1], [0], [0], [1], [0, 0, 1, 1], [], []>} : vector<64x32xbf16>, vector<32x32xbf16>, vector<64x32xf32> -> vector<64x32xf32>
    %c0_9 = arith.constant 0 : index
    %c0_10 = arith.constant 0 : index
    %10 = vector.load %arg5[%c0_9, %c0_10] : memref<32x32xbf16, #tpu.memory_space<vmem>>, vector<32x32xbf16>
    %cst_11 = arith.constant dense<0.000000e+00> : vector<64x32xf32>
    %11 = tpu.matmul %7, %10, %cst_11 {dimension_numbers = #tpu.dot_dimension_numbers<[1], [0], [0], [1], [0, 0, 1, 1], [], []>} : vector<64x32xbf16>, vector<32x32xbf16>, vector<64x32xf32> -> vector<64x32xf32>
    %c0_12 = arith.constant 0 : index
    %c0_13 = arith.constant 0 : index
    %12 = vector.load %arg6[%c0_12, %c0_13] : memref<32x32xbf16, #tpu.memory_space<vmem>>, vector<32x32xbf16>
    %cst_14 = arith.constant dense<0.000000e+00> : vector<64x32xf32>
    %13 = tpu.matmul %7, %12, %cst_14 {dimension_numbers = #tpu.dot_dimension_numbers<[1], [0], [0], [1], [0, 0, 1, 1], [], []>} : vector<64x32xbf16>, vector<32x32xbf16>, vector<64x32xf32> -> vector<64x32xf32>
    %14 = arith.truncf %9 : vector<64x32xf32> to vector<64x32xbf16>
    %15 = arith.truncf %11 : vector<64x32xf32> to vector<64x32xbf16>
    %cst_15 = arith.constant dense<0.000000e+00> : vector<64x64xf32>
    %16 = tpu.matmul %14, %15, %cst_15 {dimension_numbers = #tpu.dot_dimension_numbers<[1], [1], [0], [0], [0, 0, 1, 0], [], []>} : vector<64x32xbf16>, vector<64x32xbf16>, vector<64x64xf32> -> vector<64x64xf32>
    %cst_16 = arith.constant dense<0xFF800000> : vector<64xf32>
    %17 = vector.multi_reduction <maximumf>, %16, %cst_16 [1] : vector<64x64xf32> to vector<64xf32>
    %18 = vector.shape_cast %17 : vector<64xf32> to vector<64x1xf32>
    %19 = vector.broadcast %18 : vector<64x1xf32> to vector<64x64xf32>
    %20 = arith.subf %16, %19 : vector<64x64xf32>
    %21 = math.exp %20 : vector<64x64xf32>
    %cst_17 = arith.constant dense<0.000000e+00> : vector<64xf32>
    %22 = vector.multi_reduction <add>, %21, %cst_17 [1] : vector<64x64xf32> to vector<64xf32>
    %23 = vector.shape_cast %22 : vector<64xf32> to vector<64x1xf32>
    %24 = vector.broadcast %23 : vector<64x1xf32> to vector<64x64xf32>
    %25 = arith.divf %21, %24 : vector<64x64xf32>
    %26 = arith.truncf %25 : vector<64x64xf32> to vector<64x64xbf16>
    %27 = arith.truncf %13 : vector<64x32xf32> to vector<64x32xbf16>
    %cst_18 = arith.constant dense<0.000000e+00> : vector<64x32xf32>
    %28 = tpu.matmul %26, %27, %cst_18 {dimension_numbers = #tpu.dot_dimension_numbers<[1], [0], [0], [1], [0, 0, 1, 1], [], []>} : vector<64x64xbf16>, vector<64x32xbf16>, vector<64x32xf32> -> vector<64x32xf32>
    %29 = arith.truncf %28 : vector<64x32xf32> to vector<64x32xbf16>
    %c0_19 = arith.constant 0 : index
    %c0_20 = arith.constant 0 : index
    %30 = vector.load %arg7[%c0_19, %c0_20] : memref<32x32xbf16, #tpu.memory_space<vmem>>, vector<32x32xbf16>
    %cst_21 = arith.constant dense<0.000000e+00> : vector<64x32xf32>
    %31 = tpu.matmul %29, %30, %cst_21 {dimension_numbers = #tpu.dot_dimension_numbers<[1], [0], [0], [1], [0, 0, 1, 1], [], []>} : vector<64x32xbf16>, vector<32x32xbf16>, vector<64x32xf32> -> vector<64x32xf32>
    %32 = arith.addf %6, %31 : vector<64x32xf32>
    %c0_22 = arith.constant 0 : index
    %c0_23 = arith.constant 0 : index
    %c0_24 = arith.constant 0 : index
    %33 = vector.load %arg8[%c0_22, %c0_23, %c0_24] : memref<1x64x32xf32, #tpu.memory_space<vmem>>, vector<1x64x32xf32>
    %34 = vector.shape_cast %33 : vector<1x64x32xf32> to vector<64x32xf32>
    %35 = vector.shape_cast %32 : vector<64x32xf32> to vector<1x64x32xf32>
    tpu.vector_store %arg8[%c0_22, %c0_23, %c0_24], %35 {strides = array<i32>} : memref<1x64x32xf32, #tpu.memory_space<vmem>>, vector<1x64x32xf32>,
    %c0_25 = arith.constant 0 : index
    %c0_26 = arith.constant 0 : index
    %c0_27 = arith.constant 0 : index
    %36 = vector.load %arg9[%c0_25, %c0_26, %c0_27] : memref<1x64x64xf32, #tpu.memory_space<vmem>>, vector<1x64x64xf32>
    %37 = vector.shape_cast %36 : vector<1x64x64xf32> to vector<64x64xf32>
    %38 = vector.shape_cast %25 : vector<64x64xf32> to vector<1x64x64xf32>
    tpu.vector_store %arg9[%c0_25, %c0_26, %c0_27], %38 {strides = array<i32>} : memref<1x64x64xf32, #tpu.memory_space<vmem>>, vector<1x64x64xf32>,
    %cst_28 = arith.constant dense<0.000000e+00> : vector<64xf32>
    %39 = vector.multi_reduction <add>, %25, %cst_28 [0] : vector<64x64xf32> to vector<64xf32>
    %40 = vector.shape_cast %39 : vector<64xf32> to vector<1x64xf32>
    %cst_29 = arith.constant 1.562500e-02 : f32
    %41 = vector.broadcast %cst_29 : f32 to vector<1x64xf32>
    %42 = arith.mulf %40, %41 : vector<1x64xf32>
    %c0_30 = arith.constant 0 : index
    %c0_31 = arith.constant 0 : index
    %c0_32 = arith.constant 0 : index
    %43 = vector.load %arg10[%c0_30, %c0_31, %c0_32] : memref<1x1x64xf32, #tpu.memory_space<vmem>>, vector<1x1x64xf32>
    %44 = vector.shape_cast %43 : vector<1x1x64xf32> to vector<1x64xf32>
    %45 = vector.shape_cast %42 : vector<1x64xf32> to vector<1x1x64xf32>
    tpu.vector_store %arg10[%c0_30, %c0_31, %c0_32], %45 {strides = array<i32>} : memref<1x1x64xf32, #tpu.memory_space<vmem>>, vector<1x1x64xf32>,
    return
  }
  func.func @transform_0(%arg0: i32) -> (i32, i32, i32) {
    %c0_i32 = arith.constant 0 : i32
    %c0_i32_0 = arith.constant 0 : i32
    %c0_i32_1 = arith.constant 0 : i32
    return %arg0, %c0_i32, %c0_i32_0 : i32, i32, i32
  }
  func.func @transform_1(%arg0: i32) -> (i32, i32) {
    %c0_i32 = arith.constant 0 : i32
    %c0_i32_0 = arith.constant 0 : i32
    %c0_i32_1 = arith.constant 0 : i32
    return %c0_i32, %c0_i32_0 : i32, i32
  }
  func.func @transform_2(%arg0: i32) -> (i32, i32) {
    %c0_i32 = arith.constant 0 : i32
    %c0_i32_0 = arith.constant 0 : i32
    %c0_i32_1 = arith.constant 0 : i32
    return %c0_i32, %c0_i32_0 : i32, i32
  }
  func.func @transform_3(%arg0: i32) -> (i32, i32) {
    %c0_i32 = arith.constant 0 : i32
    %c0_i32_0 = arith.constant 0 : i32
    %c0_i32_1 = arith.constant 0 : i32
    return %c0_i32, %c0_i32_0 : i32, i32
  }
  func.func @transform_4(%arg0: i32) -> (i32, i32) {
    %c0_i32 = arith.constant 0 : i32
    %c0_i32_0 = arith.constant 0 : i32
    %c0_i32_1 = arith.constant 0 : i32
    return %c0_i32, %c0_i32_0 : i32, i32
  }
  func.func @transform_5(%arg0: i32) -> (i32, i32) {
    %c0_i32 = arith.constant 0 : i32
    %c0_i32_0 = arith.constant 0 : i32
    %c0_i32_1 = arith.constant 0 : i32
    return %c0_i32, %c0_i32_0 : i32, i32
  }
  func.func @transform_6(%arg0: i32) -> (i32, i32) {
    %c0_i32 = arith.constant 0 : i32
    %c0_i32_0 = arith.constant 0 : i32
    %c0_i32_1 = arith.constant 0 : i32
    return %c0_i32, %c0_i32_0 : i32, i32
  }
  func.func @transform_7(%arg0: i32) -> (i32, i32, i32) {
    %c0_i32 = arith.constant 0 : i32
    %c0_i32_0 = arith.constant 0 : i32
    %c0_i32_1 = arith.constant 0 : i32
    return %arg0, %c0_i32, %c0_i32_0 : i32, i32, i32
  }
  func.func @transform_8(%arg0: i32) -> (i32, i32, i32) {
    %c0_i32 = arith.constant 0 : i32
    %c0_i32_0 = arith.constant 0 : i32
    %c0_i32_1 = arith.constant 0 : i32
    return %arg0, %c0_i32, %c0_i32_0 : i32, i32, i32
  }
  func.func @transform_9(%arg0: i32) -> (i32, i32, i32) {
    %c0_i32 = arith.constant 0 : i32
    %c0_i32_0 = arith.constant 0 : i32
    %c0_i32_1 = arith.constant 0 : i32
    return %arg0, %c0_i32, %c0_i32_0 : i32, i32, i32
  }
}

</mosaic_0001>

<bundles_post_ra>
// kernel: nerf_tokenizer.1
= control target key start
LH: loop header
LB: loop body
LE: loop exit
PB: predicated region body
PF: predicated region fallthrough
CT: control target
= control target key end

     0   :  { %s2067_s0 = inlined_call_operand.vmem [shape: f32[2,64,256], index: 0, kind: input, shape index: {}]   ;;  %s2068_s1 = inlined_call_operand.vmem [shape: bf16[256,32], index: 1, kind: input, shape index: {}]   ;;  %s2069_s2 = inlined_call_operand.vmem [shape: f32[64,32], index: 2, kind: input, shape index: {}]   ;;  %s2070_s3 = inlined_call_operand.vmem [shape: bf16[32,32], index: 3, kind: input, shape index: {}]   ;;  %s2071_s4 = inlined_call_operand.vmem [shape: bf16[32,32], index: 4, kind: input, shape index: {}]   ;;  %s2072_s5 = inlined_call_operand.vmem [shape: bf16[32,32], index: 5, kind: input, shape index: {}]   ;;  %s2073_s6 = inlined_call_operand.vmem [shape: bf16[32,32], index: 6, kind: input, shape index: {}]   ;;  %s2074_s7 = inlined_call_operand.vmem [shape: f32[2,64,32], index: 7, kind: output, shape index: {0}]   ;;  %s2075_s8 = inlined_call_operand.hbm [shape: f32[2,64,64], index: 8, kind: output, shape index: {1}]   ;;  %s2076_s9 = inlined_call_operand.hbm [shape: f32[2,1,64], index: 9, kind: output, shape index: {2}]  }
   0x1   :  { %2078 = sst [smem:[#allocation9_spill]] %s2067_s0 }
   0x2   :  { %2079 = sst [smem:[#allocation10_spill]] %s2068_s1 }
   0x3   :  { %2080 = sst [smem:[#allocation11_spill]] %s2069_s2 }
   0x4   :  { %2081 = sst [smem:[#allocation12_spill]] %s2070_s3 }
   0x5   :  { %2082 = sst [smem:[#allocation13_spill]] %s2071_s4 }
   0x6   :  { %15 = vsyncpa [#allocation3], 0 }
   0x7   :  { %17 = vsyncpa [#allocation3 + $0x1], 0 }
   0x8   :  { %18 = vsyncpa [#allocation5], 0 }
   0x9   :  { %20 = vsyncpa [#allocation5 + $0x1], 0  ;;  %s1679_s30 = smov 0   ;;  %s1681_s10 = smov 0  }
   0xa   :  { %s1683_s11 = smov 0   ;;  %s1685_s12 = smov 0  }
   0xb LB: > { %s1700_s13 = sadd.s32 4294967295, %s1625_s12   ;;  %s1292_s14 = sadd.s32 4294967294, %s1625_s12   ;;  %s1625_s12 = sphi %s1685_s12, %s2096_s12   ;;  %s1621_s11 = sphi %s1683_s11, %s2095_s11   ;;  %s1617_s10 = sphi %s1681_s10, %s2094_s10   ;;  %s1613_s30 = sphi %s1679_s30, %s2093_s30  }
   0xc   : > { %s1704_s15 = sadd.s32 1, %s1625_s12   ;;  %s211_s16 = sadd.s32 1, %s1621_s11 }
   0xd   : > { %s208_s17 = ssub.s32 %s1625_s12, %s1704_s15  ;;  %p221_p0 = scmp.ne.s32.totalorder %s1621_s11, %s1617_s10 }
   0xe   : > { %p209_p1 = scmp.eq.s32.totalorder %s208_s17, 0  ;;  %p222_p2 = scmp.eq.s32.totalorder %s1700_s13, 1 }
   0xf   : > { %p227_p3 = scmp.ne.s32.totalorder %s1617_s10, %s1613_s30  ;;  %p228_p4 = scmp.eq.s32.totalorder %s1292_s14, 1 }
  0x10   : > { %s1715_s18 = scalar_select %p209_p1, %s1621_s11, %s211_s16  }
  0x11   : > { %p1717_p5 = por %p222_p2, %p221_p0  ;;  %p1721_p6 = por %p228_p4, %p227_p3 }
  0x12   : > { %2083 = sst [smem:[#allocation8_spill]] %s1715_s18  ;;  %p1295_p7 = scmp.ge.s32.totalorder %s1625_s12, 1 }
  0x13   : > { %p298_p8 = scmp.lt.s32.totalorder %s1625_s12, 3 }
  0x15   : > { %p299_p9 = pnand %p1295_p7, %p298_p8 }
  0x16   : > { %s2086_s1 = sld [smem:[#allocation10_spill]] (!%p299_p9)  ;;  %p343_p10 = scmp.lt.s32.totalorder (!%p299_p9), %s1700_s13, 1 }
  0x17   : > { %302 = sbr.rel (%p299_p9) target bundleno = 1149 (0x47d), region = 48  ;;  %s2087_s0 = sld [smem:[#allocation9_spill]] (!%p299_p9) }
  0x18   : > { %s2088_s3 = sld [smem:[#allocation12_spill]] (!%p299_p9)  ;;  %s1928_s25 = sand.u32 (!%p299_p9), 1, %s1617_s10  }
  0x19   : > { %s2089_s4 = sld [smem:[#allocation13_spill]] (!%p299_p9)  ;;  %s1296_s26 = sshll.u32 (!%p299_p9), %s1928_s25, 6 }
  0x1a   : > { %s2090_s2 = sld [smem:[#allocation11_spill]] (!%p299_p9)  ;;  %s1934_s27 = scalar_lea.vmem (!%p299_p9), [#allocation2], %s1296_s26 }
  0x1b   : > { %s2077_s16 = scalar_lea.vmem (!%p299_p9), [#allocation4], %s1928_s25  ;;  %s1452_s18 = sshll.u32 (!%p299_p9), %s1700_s13, 6 }
  0x1c   : > { %v1435_v0 = vld [vmem:[%s2086_s1 + $0x38] sm:$0xff]  ;;  %v1434_v2 = vld [vmem:[%s2086_s1 + $0x30] sm:$0xff]  ;;  %v1433_v4 = vld [vmem:[%s2086_s1 + $0x28] sm:$0xff]  ;;  %s1759_s29 = scalar_select %p343_p10, %s1700_s13, 1  ;;  %vm592_vm0 = vcmask 261120   ;;  %vm785_vm1 = vcmask 523264  }
  0x1d   : > { %v1443_v1 = vld [vmem:[%s2086_s1 + $0x78] sm:$0xff]  ;;  %514 = vmatpush.bf16.msra.mxu0 %v1435_v0  ;;  %v1442_v3 = vld [vmem:[%s2086_s1 + $0x70] sm:$0xff]  ;;  %v1441_v5 = vld [vmem:[%s2086_s1 + $0x68] sm:$0xff]  ;;  %s1160_s24 = scalar_lea.hbm %s2075_s8, %s1452_s18  ;;  %s1161_s17 = sshll.u32 %s1934_s27, 4  ;;  %s1162_s17 = int_to_ptr.vmem [resolvable:$true] %s1161_s17 }
  0x1e   : > { %543 = vmatpush.bf16.msra.mxu1 %v1443_v1  ;;  %v1432_v6 = vld [vmem:[%s2086_s1 + $0x20] sm:$0xff]  ;;  %v1431_v8 = vld [vmem:[%s2086_s1 + $0x18] sm:$0xff]  ;;  %v1430_v10 = vld [vmem:[%s2086_s1 + $0x10] sm:$0xff]  ;;  %s1426_s22 = sshll.u32 %s1759_s29, 7  ;;  %s1163_s21 = sshll.u32 %s1160_s24, 4  ;;  %s1164_s21 = int_to_ptr.hbm [resolvable:$true] %s1163_s21 }
  0x1f   : > { %v1440_v7 = vld [vmem:[%s2086_s1 + $0x60] sm:$0xff]  ;;  %v1439_v9 = vld [vmem:[%s2086_s1 + $0x58] sm:$0xff]  ;;  %v1438_v11 = vld [vmem:[%s2086_s1 + $0x50] sm:$0xff]  ;;  %s1777_s14 = scalar_lea.vmem %s2087_s0, %s1426_s22  ;;  %s1545_s0 = sshra.s32 %s1164_s21, 4  ;;  %s1546_s0 = int_to_ptr.hbm [resolvable:$true] %s1545_s0 }
  0x20   : > { %v1429_v12 = vld [vmem:[%s2086_s1 + $0x8] sm:$0xff]  ;;  %v1428_v14 = vld [vmem:[%s2086_s1] sm:$0xff]  ;;  %v356_v17 = vld [vmem:[%s1777_s14 + $0x10] sm:$0xff]  ;;  %s1551_s18 = scalar_lea.hbm %s2075_s8, 128  ;;  %p1552_p0 = scmp.lt.s32.totalorder %s1546_s0, %s2075_s8 }
  0x21   : > { %515 = vmatpush.bf16.msra.mxu0 %v1434_v2  ;;  %v1437_v13 = vld [vmem:[%s2086_s1 + $0x48] sm:$0xff]  ;;  %v1436_v15 = vld [vmem:[%s2086_s1 + $0x40] sm:$0xff]  ;;  %v357_v19 = vld [vmem:[%s1777_s14 + $0x18] sm:$0xff]  ;;  %s1547_s1 = scalar_lea.hbm %s1546_s0, 64 }
  0x22   : > { %544 = vmatpush.bf16.msra.mxu1 %v1442_v3  ;;  %v354_v16 = vld [vmem:[%s1777_s14] sm:$0xff]  ;;  %v355_v18 = vld [vmem:[%s1777_s14 + $0x8] sm:$0xff]  ;;  %v360_v23 = vld [vmem:[%s1777_s14 + $0x30] sm:$0xff]  ;;  %p1548_p11 = scmp.ne.s32.totalorder %s1546_s0, %s1547_s1  ;;  %p1553_p1 = scmp.lt.s32.totalorder %s1551_s18, %s1547_s1 }
  0x23   : > { %v370_v20 = vpack.c.bf16 %v356_v17, %v354_v16  ;;  %v371_v21 = vpack.c.bf16 %v357_v19, %v355_v18  ;;  %v358_v22 = vld [vmem:[%s1777_s14 + $0x20] sm:$0xff]  ;;  %v359_v24 = vld [vmem:[%s1777_s14 + $0x28] sm:$0xff]  ;;  %v361_v25 = vld [vmem:[%s1777_s14 + $0x38] sm:$0xff] }
  0x24   : > { %v372_v26 = vpack.c.bf16 %v360_v23, %v358_v22  ;;  %v373_v27 = vpack.c.bf16 %v361_v25, %v359_v24  ;;  %v362_v28 = vld [vmem:[%s1777_s14 + $0x40] sm:$0xff]  ;;  %v364_v29 = vld [vmem:[%s1777_s14 + $0x50] sm:$0xff]  ;;  %v363_v30 = vld [vmem:[%s1777_s14 + $0x48] sm:$0xff]  ;;  %p1549_p12 = pnand %p1548_p11, %p1717_p5  ;;  %p1554_p2 = por %p1553_p1, %p1552_p0 }
  0x25   : > { %516 = vmatpush.bf16.msra.mxu0 %v1433_v4  ;;  %v365_v31 = vld [vmem:[%s1777_s14 + $0x58] sm:$0xff]  ;;  %v374_v32 = vpack.c.bf16 %v364_v29, %v362_v28  ;;  %v366_v34 = vld [vmem:[%s1777_s14 + $0x60] sm:$0xff]  ;;  %v368_v35 = vld [vmem:[%s1777_s14 + $0x70] sm:$0xff] }
  0x26   : > { %545 = vmatpush.bf16.msra.mxu1 %v1441_v5  ;;  %v375_v33 = vpack.c.bf16 %v365_v31, %v363_v30  ;;  %v367_v36 = vld [vmem:[%s1777_s14 + $0x68] sm:$0xff]  ;;  %v369_v37 = vld [vmem:[%s1777_s14 + $0x78] sm:$0xff]  ;;  %v376_v38 = vpack.c.bf16 %v368_v35, %v366_v34  ;;  %v1444_v42 = vld [vmem:[%s2088_s3] sm:$0xff]  ;;  %s1175_s14 = scalar_lea.hbm %s2076_s9, %s1700_s13  ;;  %p1550_p13 = pneg %p1549_p12 }
  0x27   : > { %v377_v39 = vpack.c.bf16 %v369_v37, %v367_v36  ;;  %v1445_v40 = vld [vmem:[%s2088_s3 + $0x8] sm:$0xff]  ;;  %v1446_v43 = vld [vmem:[%s2089_s4] sm:$0xff]  ;;  %v412_v57 = vld [vmem:[%s2090_s2 + $0x10] sm:$0xff] }
  0x28   : > { %v1447_v41 = vld [vmem:[%s2089_s4 + $0x8] sm:$0xff]  ;;  %611 = vmatpush.bf16.msra.mxu2 %v1445_v40  ;;  %v410_v46 = vld [vmem:[%s2090_s2] sm:$0xff]  ;;  %v413_v58 = vld [vmem:[%s2090_s2 + $0x18] sm:$0xff]  ;;  %p1555_p3 = pnand %p1554_p2, %p1550_p13 }
  0x29   : > { %517 = vmatpush.bf16.msra.mxu0 %v1432_v6  ;;  %656 = vmatpush.bf16.msra.mxu3 %v1447_v41  ;;  %v411_v47 = vld [vmem:[%s2090_s2 + $0x8] sm:$0xff]  ;;  %v1448_v5 = vld [vmem:[%s2072_s5] sm:$0xff]  ;;  %v416_v17 = vld [vmem:[%s2090_s2 + $0x30] sm:$0xff] }
  0x2a   : > { %546 = vmatpush.bf16.msra.mxu1 %v1440_v7  ;;  %v1449_v2 = vld [vmem:[%s2072_s5 + $0x8] sm:$0xff]  ;;  %v414_v6 = vld [vmem:[%s2090_s2 + $0x20] sm:$0xff]  ;;  %v417_v18 = vld [vmem:[%s2090_s2 + $0x38] sm:$0xff] }
  0x2b   : > { %v415_v7 = vld [vmem:[%s2090_s2 + $0x28] sm:$0xff] }
  0x2c   : > { %612 = vmatpush.bf16.msra.mxu2 %v1444_v42 }
  0x2d   : > { %518 = vmatpush.bf16.msra.mxu0 %v1431_v8  ;;  %657 = vmatpush.bf16.msra.mxu3 %v1446_v43 }
  0x2e   : > { %547 = vmatpush.bf16.msra.mxu1 %v1439_v9 }
  0x30   : > { %701 = vmatpush.bf16.msrb.mxu2 %v1449_v2 }
  0x31   : > { %519 = vmatpush.bf16.msra.mxu0 %v1430_v10 }
  0x32   : > { %548 = vmatpush.bf16.msra.mxu1 %v1438_v11 }
  0x34   : > { %702 = vmatpush.bf16.msrb.mxu2 %v1448_v5 }
  0x35   : > { %520 = vmatpush.bf16.msra.mxu0 %v1429_v12 }
  0x36   : > { %549 = vmatpush.bf16.msra.mxu1 %v1437_v13 }
  0x39   : > { %521 = vmatpush.bf16.msra.mxu0 %v1428_v14 }
  0x3a   : > { %550 = vmatpush.bf16.msra.mxu1 %v1436_v15 }
  0x3c   : > { %522 = vmatmul.bf16.vlgmr.msra.gmra.mxu0 %v370_v20 }
  0x3d   : > { %551 = vmatmul.bf16.vlgmr.msra.gmra.mxu1 %v371_v21 }
  0x4c   : > { %527 = vmatmul.bf16.gmra.mxu0 %v372_v26 }
  0x4d   : > { %556 = vmatmul.bf16.gmra.mxu1 %v373_v27 }
  0x5c   : > { %532 = vmatmul.bf16.gmra.mxu0 %v374_v32 }
  0x5d   : > { %561 = vmatmul.bf16.gmra.mxu1 %v375_v33 }
  0x6c   : > { %537 = vmatmul.bf16.gmra.mxu0 %v376_v38 }
  0x6d   : > { %566 = vmatmul.bf16.gmra.mxu1 %v377_v39 }
  0xb9   : > { %v523_v44 = vpop.f32.mrf.mxu0 }
  0xba   : > { %v552_v45 = vpop.f32.mrf.mxu1  ;;  %v524_v48 = vadd.f32 %v523_v44, %v410_v46 }
  0xbc   : > { %v1819_v52 = vadd.f32 %v552_v45, %v524_v48 }
  0xc1   : > { %v525_v49 = vpop.f32.mrf.mxu0 }
  0xc2   : > { %v554_v50 = vpop.f32.mrf.mxu1  ;;  %v526_v51 = vadd.f32 %v525_v49, %v411_v47 }
  0xc4   : > { %v1821_v53 = vadd.f32 %v554_v50, %v526_v51 }
  0xc6   : > { %v572_v54 = vpack.c.bf16 %v1821_v53, %v1819_v52 }
  0xc8   : > { %1373 = vmatmul.msk.bf16.vlgmr.msra.gmra.mxu2 %vm592_vm0, %v572_v54  ;;  %1385 = vmatmul.msk.bf16.vlgmr.msra.gmra.mxu3 %vm592_vm0, %v572_v54 }
  0xc9   : > { %v528_v55 = vpop.f32.mrf.mxu0 }
  0xca   : > { %v557_v56 = vpop.f32.mrf.mxu1  ;;  %v529_v59 = vadd.f32 %v528_v55, %v412_v57 }
  0xcc   : > { %v1833_v63 = vadd.f32 %v557_v56, %v529_v59 }
  0xd1   : > { %v530_v60 = vpop.f32.mrf.mxu0 }
  0xd2   : > { %v559_v61 = vpop.f32.mrf.mxu1  ;;  %v531_v62 = vadd.f32 %v530_v60, %v413_v58 }
  0xd4   : > { %v1835_v0 = vadd.f32 %v559_v61, %v531_v62 }
  0xd6   : > { %v573_v1 = vpack.c.bf16 %v1835_v0, %v1833_v63 }
  0xd8   : > { %1374 = vmatmul.msk.bf16.gmra.mxu2 %vm592_vm0, %v573_v1  ;;  %1386 = vmatmul.msk.bf16.gmra.mxu3 %vm592_vm0, %v573_v1 }
  0xd9   : > { %v533_v3 = vpop.f32.mrf.mxu0 }
  0xda   : > { %v562_v4 = vpop.f32.mrf.mxu1  ;;  %v534_v8 = vadd.f32 %v533_v3, %v414_v6 }
  0xdc   : > { %v1853_v12 = vadd.f32 %v562_v4, %v534_v8 }
  0xe1   : > { %v535_v9 = vpop.f32.mrf.mxu0 }
  0xe2   : > { %v564_v10 = vpop.f32.mrf.mxu1  ;;  %v536_v11 = vadd.f32 %v535_v9, %v415_v7 }
  0xe4   : > { %v1855_v13 = vadd.f32 %v564_v10, %v536_v11 }
  0xe6   : > { %v574_v14 = vpack.c.bf16 %v1855_v13, %v1853_v12 }
  0xe8   : > { %1375 = vmatmul.msk.bf16.gmra.mxu2 %vm592_vm0, %v574_v14  ;;  %1387 = vmatmul.msk.bf16.gmra.mxu3 %vm592_vm0, %v574_v14 }
  0xe9   : > { %v538_v15 = vpop.f32.mrf.mxu0 }
  0xea   : > { %v567_v16 = vpop.f32.mrf.mxu1  ;;  %v539_v19 = vadd.f32 %v538_v15, %v416_v17 }
  0xec   : > { %v1867_v23 = vadd.f32 %v567_v16, %v539_v19 }
  0xf1   : > { %v540_v20 = vpop.f32.mrf.mxu0 }
  0xf2   : > { %v541_v21 = vadd.f32 %v540_v20, %v417_v18  ;;  %v569_v22 = vpop.f32.mrf.mxu1 }
  0xf4   : > { %v1869_v24 = vadd.f32 %v569_v22, %v541_v21 }
  0xf6   : > { %v575_v25 = vpack.c.bf16 %v1869_v24, %v1867_v23 }
  0xf8   : > { %1376 = vmatmul.msk.bf16.gmra.mxu2 %vm592_vm0, %v575_v25  ;;  %1388 = vmatmul.msk.bf16.gmra.mxu3 %vm592_vm0, %v575_v25 }
 0x108   : > { %1397 = vmatmul.msk.bf16.vlgmr.msrb.gmra.mxu2 %vm592_vm0, %v572_v54 }
 0x118   : > { %1398 = vmatmul.msk.bf16.gmra.mxu2 %vm592_vm0, %v573_v1 }
 0x128   : > { %1399 = vmatmul.msk.bf16.gmra.mxu2 %vm592_vm0, %v574_v14 }
 0x138   : > { %1400 = vmatmul.msk.bf16.gmra.mxu2 %vm592_vm0, %v575_v25 }
 0x14b   : > { %v614_v26 = vpop.f32.mrf.mxu2  ;;  %v659_v27 = vpop.f32.mrf.mxu3 }
 0x153   : > { %v616_v28 = vpop.f32.mrf.mxu2  ;;  %v661_v29 = vpop.f32.mrf.mxu3 }
 0x154   : > { %v724_v30 = vpack.c.bf16 %v616_v28, %v614_v26  ;;  %v728_v31 = vpack.c.bf16 %v661_v29, %v659_v27 }
 0x156   : > { %v745_v58 = vsel %vm592_vm0, %v728_v31, 0 }
 0x15b   : > { %v619_v32 = vpop.f32.mrf.mxu2  ;;  %v664_v33 = vpop.f32.mrf.mxu3 }
 0x163   : > { %v621_v34 = vpop.f32.mrf.mxu2  ;;  %v666_v35 = vpop.f32.mrf.mxu3 }
 0x164   : > { %v725_v36 = vpack.c.bf16 %v621_v34, %v619_v32  ;;  %v729_v54 = vpack.c.bf16 %v666_v35, %v664_v33 }
 0x166   : > { %v748_v56 = vsel %vm592_vm0, %v729_v54, 0 }
 0x16b   : > { %v624_v37 = vpop.f32.mrf.mxu2  ;;  %v669_v38 = vpop.f32.mrf.mxu3 }
 0x173   : > { %v626_v39 = vpop.f32.mrf.mxu2  ;;  %v671_v40 = vpop.f32.mrf.mxu3 }
 0x174   : > { %v726_v41 = vpack.c.bf16 %v626_v39, %v624_v37  ;;  %v730_v49 = vpack.c.bf16 %v671_v40, %v669_v38 }
 0x176   : > { %v751_v51 = vsel %vm592_vm0, %v730_v49, 0 }
 0x17b   : > { %v629_v42 = vpop.f32.mrf.mxu2  ;;  %v674_v43 = vpop.f32.mrf.mxu3 }
 0x183   : > { %v631_v44 = vpop.f32.mrf.mxu2  ;;  %v676_v45 = vpop.f32.mrf.mxu3 }
 0x184   : > { %v727_v46 = vpack.c.bf16 %v631_v44, %v629_v42  ;;  %v731_v47 = vpack.c.bf16 %v676_v45, %v674_v43 }
 0x186   : > { %v754_v48 = vsel %vm592_vm0, %v731_v47, 0 }
 0x187   : > { %760 = vmatpush.bf16.xpose.msrb.mxu3 %v754_v48 }
 0x18b   : > { %v704_v50 = vpop.f32.mrf.mxu2 }
 0x18f   : > { %761 = vmatpush.bf16.xpose.msrb.mxu3 %v751_v51 }
 0x193   : > { %v706_v55 = vpop.f32.mrf.mxu2 }
 0x194   : > { %v982_v5 = vpack.c.bf16 %v706_v55, %v704_v50 }
 0x197   : > { %762 = vmatpush.bf16.xpose.msrb.mxu3 %v748_v56 }
 0x19b   : > { %v709_v57 = vpop.f32.mrf.mxu2 }
 0x19f   : > { %763 = vmatpush.bf16.xpose.msrb.mxu3 %v745_v58 }
 0x1a3   : > { %v711_v59 = vpop.f32.mrf.mxu2 }
 0x1a4   : > { %v983_v4 = vpack.c.bf16 %v711_v59, %v709_v57 }
 0x1a6   : > { %1401 = vmatmul.msk.bf16.vlgmr.msrb.gmra.mxu3 %vm592_vm0, %v724_v30 }
 0x1ab   : > { %v714_v60 = vpop.f32.mrf.mxu2 }
 0x1b3   : > { %v716_v61 = vpop.f32.mrf.mxu2 }
 0x1b4   : > { %v984_v3 = vpack.c.bf16 %v716_v61, %v714_v60 }
 0x1b6   : > { %1402 = vmatmul.msk.bf16.gmra.mxu3 %vm592_vm0, %v725_v36 }
 0x1bb   : > { %v719_v62 = vpop.f32.mrf.mxu2 }
 0x1c3   : > { %v721_v1 = vpop.f32.mrf.mxu2 }
 0x1c4   : > { %v985_v2 = vpack.c.bf16 %v721_v1, %v719_v62 }
 0x1c6   : > { %1403 = vmatmul.msk.bf16.gmra.mxu3 %vm592_vm0, %v726_v41  ;;  %1002 = vmatpush.bf16.msrb.mxu0 %v985_v2 }
 0x1ca   : > { %1003 = vmatpush.bf16.msrb.mxu0 %v984_v3 }
 0x1ce   : > { %1004 = vmatpush.bf16.msrb.mxu0 %v983_v4 }
 0x1d2   : > { %1005 = vmatpush.bf16.msrb.mxu0 %v982_v5 }
 0x1d6   : > { %1404 = vmatmul.msk.bf16.gmra.mxu3 %vm592_vm0, %v727_v46 }
 0x229   : > { %v765_v6 = vpop.f32.mrf.mxu3 }
 0x22a   : > { %v786_v7 = vsel %vm785_vm1, %v765_v6, -inf }
 0x22b   : > { %787 = vmax.xlane.f32.xlu0 %v786_v7 }
 0x231   : > { %v767_v8 = vpop.f32.mrf.mxu3 }
 0x232   : > { %v789_v9 = vsel %vm785_vm1, %v767_v8, -inf }
 0x233   : > { %790 = vmax.xlane.f32.xlu0 %v789_v9 }
 0x239   : > { %v770_v10 = vpop.f32.mrf.mxu3 }
 0x23a   : > { %v792_v11 = vsel %vm785_vm1, %v770_v10, -inf }
 0x23b   : > { %793 = vmax.xlane.f32.xlu1 %v792_v11 }
 0x241   : > { %v772_v14 = vpop.f32.mrf.mxu3 }
 0x242   : > { %v795_v15 = vsel %vm785_vm1, %v772_v14, -inf }
 0x243   : > { %796 = vmax.xlane.f32.xlu1 %v795_v15 }
 0x249   : > { %v775_v16 = vpop.f32.mrf.mxu3 }
 0x24a   : > { %v798_v17 = vsel %vm785_vm1, %v775_v16, -inf }
 0x24b   : > { %799 = vmax.xlane.f32.xlu2 %v798_v17 }
 0x251   : > { %v777_v18 = vpop.f32.mrf.mxu3 }
 0x252   : > { %v801_v19 = vsel %vm785_vm1, %v777_v18, -inf }
 0x253   : > { %802 = vmax.xlane.f32.xlu2 %v801_v19 }
 0x259   : > { %v780_v20 = vpop.f32.mrf.mxu3 }
 0x25a   : > { %v804_v21 = vsel %vm785_vm1, %v780_v20, -inf }
 0x25b   : > { %805 = vmax.xlane.f32.xlu0 %v804_v21 }
 0x261   : > { %v782_v22 = vpop.f32.mrf.mxu3 }
 0x262   : > { %v807_v25 = vsel %vm785_vm1, %v782_v22, -inf }
 0x263   : > { %808 = vmax.xlane.f32.xlu1 %v807_v25 }
 0x29e   : > { %v788_v26 = vpop.xlane.xlu0 %787 }
 0x29f   : > { %v810_v27 = vsub.f32 %v765_v6, %v788_v26 }
 0x2a1   : > { %v818_v28 = vmul.f32 1.442695, %v810_v27 }
 0x2a3   : > { %1499 = vpow2.f32 %v818_v28 }
 0x2a6   : > { %v791_v29 = vpop.xlane.xlu0 %790 }
 0x2a7   : > { %v811_v30 = vsub.f32 %v767_v8, %v791_v29 }
 0x2a9   : > { %v1895_v31 = vpop.eup %1499  ;;  %v820_v32 = vmul.f32 1.442695, %v811_v30 }
 0x2aa   : > { %v834_v33 = vsel %vm785_vm1, %v1895_v31, 0.0 }
 0x2ab   : > { %1501 = vpow2.f32 %v820_v32  ;;  %835 = vadd.xlane.f32.xlu2 %v834_v33 }
 0x2ae   : > { %v794_v34 = vpop.xlane.xlu1 %793 }
 0x2af   : > { %v812_v35 = vsub.f32 %v770_v10, %v794_v34 }
 0x2b1   : > { %v1899_v36 = vpop.eup %1501  ;;  %v822_v37 = vmul.f32 1.442695, %v812_v35 }
 0x2b2   : > { %v837_v38 = vsel %vm785_vm1, %v1899_v36, 0.0 }
 0x2b3   : > { %1503 = vpow2.f32 %v822_v37  ;;  %838 = vadd.xlane.f32.xlu0 %v837_v38 }
 0x2b6   : > { %v797_v39 = vpop.xlane.xlu1 %796 }
 0x2b7   : > { %v813_v40 = vsub.f32 %v772_v14, %v797_v39 }
 0x2b9   : > { %v1903_v41 = vpop.eup %1503  ;;  %v824_v42 = vmul.f32 1.442695, %v813_v40 }
 0x2ba   : > { %v840_v43 = vsel %vm785_vm1, %v1903_v41, 0.0 }
 0x2bb   : > { %1505 = vpow2.f32 %v824_v42  ;;  %841 = vadd.xlane.f32.xlu1 %v840_v43 }
 0x2be   : > { %v800_v44 = vpop.xlane.xlu2 %799 }
 0x2bf   : > { %v814_v45 = vsub.f32 %v775_v16, %v800_v44 }
 0x2c1   : > { %v1907_v46 = vpop.eup %1505  ;;  %v826_v47 = vmul.f32 1.442695, %v814_v45 }
 0x2c2   : > { %v843_v48 = vsel %vm785_vm1, %v1907_v46, 0.0 }
 0x2c3   : > { %1507 = vpow2.f32 %v826_v47  ;;  %844 = vadd.xlane.f32.xlu2 %v843_v48 }
 0x2c6   : > { %v803_v49 = vpop.xlane.xlu2 %802 }
 0x2c7   : > { %v815_v50 = vsub.f32 %v777_v18, %v803_v49 }
 0x2c9   : > { %v1911_v51 = vpop.eup %1507  ;;  %v828_v54 = vmul.f32 1.442695, %v815_v50 }
 0x2ca   : > { %v846_v55 = vsel %vm785_vm1, %v1911_v51, 0.0 }
 0x2cb   : > { %1509 = vpow2.f32 %v828_v54  ;;  %847 = vadd.xlane.f32.xlu0 %v846_v55 }
 0x2ce   : > { %v806_v56 = vpop.xlane.xlu0 %805 }
 0x2cf   : > { %v816_v57 = vsub.f32 %v780_v20, %v806_v56 }
 0x2d1   : > { %v1915_v58 = vpop.eup %1509  ;;  %v830_v59 = vmul.f32 1.442695, %v816_v57 }
 0x2d2   : > { %v849_v60 = vsel %vm785_vm1, %v1915_v58, 0.0 }
 0x2d3   : > { %1511 = vpow2.f32 %v830_v59  ;;  %850 = vadd.xlane.f32.xlu1 %v849_v60 }
 0x2d6   : > { %v809_v61 = vpop.xlane.xlu1 %808 }
 0x2d7   : > { %v817_v62 = vsub.f32 %v782_v22, %v809_v61 }
 0x2d9   : > { %v1919_v1 = vpop.eup %1511  ;;  %v832_v2 = vmul.f32 1.442695, %v817_v62 }
 0x2da   : > { %v852_v3 = vsel %vm785_vm1, %v1919_v1, 0.0 }
 0x2db   : > { %1513 = vpow2.f32 %v832_v2  ;;  %853 = vadd.xlane.f32.xlu2 %v852_v3 }
 0x2e1   : > { %v1923_v4 = vpop.eup %1513 }
 0x2e2   : > { %v855_v5 = vsel %vm785_vm1, %v1923_v4, 0.0 }
 0x2e3   : > { %856 = vadd.xlane.f32.xlu0 %v855_v5 }
 0x31e   : > { %v836_v6 = vpop.xlane.xlu2 %835 }
 0x31f   : > { %1515 = vrcp.f32 %v836_v6  ;;  %v869_v11 = vand.u32 2147483648, %v836_v6  ;;  %v867_v15 = vand.u32 2147483647, %v836_v6  ;;  %vm863_vm3 = vweird.f32 %v836_v6 }
 0x321   : > { %v870_v18 = vor.u32 1.1754944e-38, %v869_v11  ;;  %vm868_vm5 = vcmp.eq.f32.partialorder %v867_v15, 8.507059e+37 }
 0x325   : > { %v1516_v7 = vpop.eup %1515 }
 0x326   : > { %v859_v8 = vmul.f32 %v1516_v7, %v836_v6  ;;  %v839_v9 = vpop.xlane.xlu0 %838  ;;  %vm864_vm2 = vweird.f32 %v1516_v7 }
 0x327   : > { %1517 = vrcp.f32 %v839_v9  ;;  %vm865_vm4 = vmor %vm863_vm3, %vm864_vm2  ;;  %v884_v27 = vand.u32 2147483648, %v839_v9  ;;  %v882_v29 = vand.u32 2147483647, %v839_v9  ;;  %vm878_vm7 = vweird.f32 %v839_v9 }
 0x328   : > { %v860_v10 = vsub.f32 1.0, %v859_v8 }
 0x329   : > { %v885_v33 = vor.u32 1.1754944e-38, %v884_v27  ;;  %vm883_vm9 = vcmp.eq.f32.partialorder %v882_v29, 8.507059e+37 }
 0x32a   : > { %v861_v14 = vmul.f32 %v1516_v7, %v860_v10 }
 0x32c   : > { %v862_v16 = vadd.f32 %v1516_v7, %v861_v14 }
 0x32d   : > { %v1518_v17 = vpop.eup %1517 }
 0x32e   : > { %v866_v19 = vsel %vm865_vm4, %v1516_v7, %v862_v16  ;;  %v874_v20 = vmul.f32 %v1518_v17, %v839_v9  ;;  %v842_v21 = vpop.xlane.xlu1 %841  ;;  %vm879_vm6 = vweird.f32 %v1518_v17 }
 0x32f   : > { %v871_v22 = vsel %vm868_vm5, %v870_v18, %v866_v19  ;;  %1519 = vrcp.f32 %v842_v21  ;;  %vm880_vm8 = vmor %vm878_vm7, %vm879_vm6  ;;  %v899_v42 = vand.u32 2147483648, %v842_v21  ;;  %v897_v44 = vand.u32 2147483647, %v842_v21 }
 0x330   : > { %v875_v25 = vsub.f32 1.0, %v874_v20  ;;  %v1932_v26 = vmul.f32 %v1895_v31, %v871_v22  ;;  %vm893_vm11 = vweird.f32 %v842_v21 }
 0x331   : > { %v900_v48 = vor.u32 1.1754944e-38, %v899_v42  ;;  %vm898_vm13 = vcmp.eq.f32.partialorder %v897_v44, 8.507059e+37 }
 0x332   : > { %v876_v28 = vmul.f32 %v1518_v17, %v875_v25  ;;  %1104 = vst.msk [vmem:[%s1934_s27] sm:$0xff] %vm785_vm1, %v1932_v26 }
 0x334   : > { %v877_v30 = vadd.f32 %v1518_v17, %v876_v28 }
 0x335   : > { %v1520_v32 = vpop.eup %1519 }
 0x336   : > { %v881_v34 = vsel %vm880_vm8, %v1518_v17, %v877_v30  ;;  %v889_v31 = vmul.f32 %v1520_v32, %v842_v21  ;;  %v845_v35 = vpop.xlane.xlu2 %844  ;;  %vm894_vm10 = vweird.f32 %v1520_v32  ;;  %v1451_v17 = vld [vmem:[%s2073_s6 + $0x8] sm:$0xff] }
 0x337   : > { %v886_v37 = vsel %vm883_vm9, %v885_v33, %v881_v34  ;;  %1521 = vrcp.f32 %v845_v35  ;;  %vm895_vm12 = vmor %vm893_vm11, %vm894_vm10  ;;  %v914_v59 = vand.u32 2147483648, %v845_v35  ;;  %v912_v60 = vand.u32 2147483647, %v845_v35  ;;  %1065 = vmatpush.bf16.msrb.mxu1 %v1451_v17 }
 0x338   : > { %v890_v38 = vsub.f32 1.0, %v889_v31  ;;  %v1940_v39 = vmul.f32 %v1899_v36, %v886_v37  ;;  %vm908_vm15 = vweird.f32 %v845_v35 }
 0x339   : > { %v915_v2 = vor.u32 1.1754944e-38, %v914_v59  ;;  %vm913_vm3 = vcmp.eq.f32.partialorder %v912_v60, 8.507059e+37 }
 0x33a   : > { %v891_v40 = vmul.f32 %v1520_v32, %v890_v38  ;;  %v978_v43 = vpack.c.bf16 %v1940_v39, %v1932_v26  ;;  %1105 = vst.msk [vmem:[%s1934_s27 + $0x8] sm:$0xff] %vm785_vm1, %v1940_v39 }
 0x33c   : > { %v892_v45 = vadd.f32 %v1520_v32, %v891_v40  ;;  %1405 = vmatmul.msk.bf16.vlgmr.msrb.gmra.mxu0 %vm785_vm1, %v978_v43 }
 0x33d   : > { %v1522_v47 = vpop.eup %1521 }
 0x33e   : > { %v904_v36 = vmul.f32 %v1522_v47, %v845_v35  ;;  %v848_v49 = vpop.xlane.xlu0 %847  ;;  %v896_v50 = vsel %vm895_vm12, %v1520_v32, %v892_v45  ;;  %vm909_vm14 = vweird.f32 %v1522_v47  ;;  %v1113_v45 = vsel %vm785_vm1, %v1940_v39, 0.0 }
 0x33f   : > { %1523 = vrcp.f32 %v848_v49  ;;  %v901_v55 = vsel %vm898_vm13, %v900_v48, %v896_v50  ;;  %vm910_vm2 = vmor %vm908_vm15, %vm909_vm14  ;;  %v929_v10 = vand.u32 2147483648, %v848_v49  ;;  %v927_v11 = vand.u32 2147483647, %v848_v49 }
 0x340   : > { %v905_v54 = vsub.f32 1.0, %v904_v36  ;;  %v1949_v56 = vmul.f32 %v1903_v41, %v901_v55  ;;  %vm923_vm5 = vweird.f32 %v848_v49  ;;  %v1112_v36 = vsel %vm785_vm1, %v1932_v26, 0.0 }
 0x341   : > { %vm928_vm7 = vcmp.eq.f32.partialorder %v927_v11, 8.507059e+37  ;;  %v1114_v55 = vadd.f32 %v1113_v45, %v1112_v36 }
 0x342   : > { %v906_v57 = vmul.f32 %v1522_v47, %v905_v54  ;;  %1106 = vst.msk [vmem:[%s1934_s27 + $0x10] sm:$0xff] %vm785_vm1, %v1949_v56 }
 0x344   : > { %v907_v61 = vadd.f32 %v1522_v47, %v906_v57 }
 0x345   : > { %v1524_v62 = vpop.eup %1523 }
 0x346   : > { %v919_v3 = vmul.f32 %v1524_v62, %v848_v49  ;;  %v851_v5 = vpop.xlane.xlu1 %850  ;;  %v911_v6 = vsel %vm910_vm2, %v1522_v47, %v907_v61  ;;  %vm924_vm4 = vweird.f32 %v1524_v62 }
 0x347   : > { %1525 = vrcp.f32 %v851_v5  ;;  %v916_v7 = vsel %vm913_vm3, %v915_v2, %v911_v6  ;;  %vm925_vm6 = vmor %vm923_vm5, %vm924_vm4  ;;  %v944_v25 = vand.u32 2147483648, %v851_v5  ;;  %v942_v29 = vand.u32 2147483647, %v851_v5 }
 0x348   : > { %v920_v41 = vsub.f32 1.0, %v919_v3  ;;  %v917_v8 = vmul.f32 %v1907_v46, %v916_v7  ;;  %v930_v46 = vor.u32 1.1754944e-38, %v929_v10  ;;  %vm938_vm9 = vweird.f32 %v851_v5 }
 0x349   : > { %v945_v33 = vor.u32 1.1754944e-38, %v944_v25  ;;  %vm943_vm11 = vcmp.eq.f32.partialorder %v942_v29, 8.507059e+37 }
 0x34a   : > { %v921_v9 = vmul.f32 %v1524_v62, %v920_v41  ;;  %v979_v14 = vpack.c.bf16 %v917_v8, %v1949_v56  ;;  %1107 = vst.msk [vmem:[%s1934_s27 + $0x18] sm:$0xff] %vm785_vm1, %v917_v8  ;;  %v1117_v39 = vsel %vm785_vm1, %v917_v8, 0.0 }
 0x34c   : > { %v922_v15 = vadd.f32 %v1524_v62, %v921_v9  ;;  %1406 = vmatmul.msk.bf16.gmra.mxu0 %vm785_vm1, %v979_v14 }
 0x34d   : > { %v1526_v16 = vpop.eup %1525 }
 0x34e   : > { %v934_v18 = vmul.f32 %v1526_v16, %v851_v5  ;;  %v854_v19 = vpop.xlane.xlu2 %853  ;;  %v926_v20 = vsel %vm925_vm6, %v1524_v62, %v922_v15  ;;  %vm939_vm8 = vweird.f32 %v1526_v16  ;;  %vm1134_vm6 = vcmask 516096  }
 0x34f   : > { %1527 = vrcp.f32 %v854_v19  ;;  %v931_v22 = vsel %vm928_vm7, %v930_v46, %v926_v20  ;;  %vm940_vm10 = vmor %vm938_vm9, %vm939_vm8  ;;  %v959_v40 = vand.u32 2147483648, %v854_v19  ;;  %v957_v43 = vand.u32 2147483647, %v854_v19 }
 0x350   : > { %v935_v21 = vsub.f32 1.0, %v934_v18  ;;  %v932_v27 = vmul.f32 %v1911_v51, %v931_v22  ;;  %vm953_vm13 = vweird.f32 %v854_v19 }
 0x351   : > { %v960_v49 = vor.u32 1.1754944e-38, %v959_v40  ;;  %vm958_vm15 = vcmp.eq.f32.partialorder %v957_v43, 8.507059e+37 }
 0x352   : > { %v936_v28 = vmul.f32 %v1526_v16, %v935_v21  ;;  %1108 = vst.msk [vmem:[%s1934_s27 + $0x20] sm:$0xff] %vm785_vm1, %v932_v27  ;;  %v1119_v3 = vsel %vm785_vm1, %v932_v27, 0.0 }
 0x354   : > { %v937_v30 = vadd.f32 %v1526_v16, %v936_v28 }
 0x355   : > { %v1528_v32 = vpop.eup %1527 }
 0x356   : > { %v941_v34 = vsel %vm940_vm10, %v1526_v16, %v937_v30  ;;  %v949_v31 = vmul.f32 %v1528_v32, %v854_v19  ;;  %v857_v35 = vpop.xlane.xlu0 %856  ;;  %vm954_vm12 = vweird.f32 %v1528_v32 }
 0x357   : > { %v946_v37 = vsel %vm943_vm11, %v945_v33, %v941_v34  ;;  %1529 = vrcp.f32 %v857_v35  ;;  %vm955_vm14 = vmor %vm953_vm13, %vm954_vm12  ;;  %v974_v26 = vand.u32 2147483648, %v857_v35  ;;  %v972_v2 = vand.u32 2147483647, %v857_v35 }
 0x358   : > { %v950_v38 = vsub.f32 1.0, %v949_v31  ;;  %v947_v51 = vmul.f32 %v1915_v58, %v946_v37  ;;  %v1115_v58 = vsel %vm785_vm1, %v1949_v56, 0.0  ;;  %vm968_vm3 = vweird.f32 %v857_v35 }
 0x359   : > { %v1116_v61 = vadd.f32 %v1115_v58, %v1114_v55  ;;  %v975_v41 = vor.u32 1.1754944e-38, %v974_v26  ;;  %vm973_vm5 = vcmp.eq.f32.partialorder %v972_v2, 8.507059e+37 }
 0x35a   : > { %v951_v42 = vmul.f32 %v1528_v32, %v950_v38  ;;  %v980_v44 = vpack.c.bf16 %v947_v51, %v932_v27  ;;  %1109 = vst.msk [vmem:[%s1934_s27 + $0x28] sm:$0xff] %vm785_vm1, %v947_v51  ;;  %v1121_v6 = vsel %vm785_vm1, %v947_v51, 0.0 }
 0x35b   : > { %v1118_v56 = vadd.f32 %v1117_v39, %v1116_v61 }
 0x35c   : > { %v952_v47 = vadd.f32 %v1528_v32, %v951_v42  ;;  %1407 = vmatmul.msk.bf16.gmra.mxu0 %vm785_vm1, %v980_v44 }
 0x35d   : > { %v1530_v48 = vpop.eup %1529  ;;  %v1120_v7 = vadd.f32 %v1119_v3, %v1118_v56 }
 0x35e   : > { %v956_v50 = vsel %vm955_vm14, %v1528_v32, %v952_v47  ;;  %v964_v54 = vmul.f32 %v1530_v48, %v857_v35  ;;  %vm969_vm2 = vweird.f32 %v1530_v48 }
 0x35f   : > { %v961_v57 = vsel %vm958_vm15, %v960_v49, %v956_v50  ;;  %vm970_vm4 = vmor %vm968_vm3, %vm969_vm2  ;;  %v1122_v10 = vadd.f32 %v1121_v6, %v1120_v7 }
 0x360   : > { %v965_v59 = vsub.f32 1.0, %v964_v54  ;;  %v962_v60 = vmul.f32 %v1919_v1, %v961_v57 }
 0x362   : > { %v966_v62 = vmul.f32 %v1530_v48, %v965_v59  ;;  %1110 = vst.msk [vmem:[%s1934_s27 + $0x30] sm:$0xff] %vm785_vm1, %v962_v60  ;;  %v1123_v1 = vsel %vm785_vm1, %v962_v60, 0.0 }
 0x363   : > { %v1124_v14 = vadd.f32 %v1123_v1, %v1122_v10 }
 0x364   : > { %v967_v5 = vadd.f32 %v1530_v48, %v966_v62 }
 0x366   : > { %v971_v8 = vsel %vm970_vm4, %v1530_v48, %v967_v5 }
 0x367   : > { %v976_v9 = vsel %vm973_vm5, %v975_v41, %v971_v8 }
 0x368   : > { %v977_v11 = vmul.f32 %v1923_v4, %v976_v9  ;;  %v1450_v4 = vld [vmem:[%s2073_s6] sm:$0xff] }
 0x369   : > { %1066 = vmatpush.bf16.msrb.mxu1 %v1450_v4 }
 0x36a   : > { %v981_v15 = vpack.c.bf16 %v977_v11, %v962_v60  ;;  %1111 = vst.msk [vmem:[%s1934_s27 + $0x38] sm:$0xff] %vm785_vm1, %v977_v11  ;;  %v1125_v16 = vsel %vm785_vm1, %v977_v11, 0.0 }
 0x36b   : > { %v1126_v17 = vadd.f32 %v1125_v16, %v1124_v14 }
 0x36c   : > { %1408 = vmatmul.msk.bf16.gmra.mxu0 %vm785_vm1, %v981_v15 }
 0x36d   : > { %v1127_v46 = vrot.slane %v1126_v17, 4 }
 0x36f   : > { %v1128_v18 = vadd.f32 %v1127_v46, %v1126_v17 }
 0x371   : > { %v1129_v19 = vrot.slane %v1128_v18, 2 }
 0x373   : > { %v1130_v20 = vadd.f32 %v1129_v19, %v1128_v18 }
 0x375   : > { %v1131_v21 = vrot.slane %v1130_v20, 1 }
 0x377   : > { %v1132_v22 = vadd.f32 %v1131_v21, %v1130_v20 }
 0x379   : > { %v1133_v25 = vmul.f32 0.015625, %v1132_v22 }
 0x37b   : > { %1135 = vst.msk [vmem:[%s2077_s16] sm:$0x1] %vm1134_vm6, %v1133_v25  ;;  %s1142_s16 = scalar_lea.sflag [#allocation3], %s1928_s25 }
 0x3b9   : > { %v1007_v27 = vpop.f32.mrf.mxu0 }
 0x3c1   : > { %v1009_v28 = vpop.f32.mrf.mxu0 }
 0x3c2   : > { %v1027_v29 = vpack.c.bf16 %v1009_v28, %v1007_v27 }
 0x3c4   : > { %1417 = vmatmul.msk.bf16.vlgmr.msrb.gmra.mxu1 %vm592_vm0, %v1027_v29 }
 0x3c9   : > { %v1012_v30 = vpop.f32.mrf.mxu0 }
 0x3d1   : > { %v1014_v32 = vpop.f32.mrf.mxu0 }
 0x3d2   : > { %v1028_v33 = vpack.c.bf16 %v1014_v32, %v1012_v30 }
 0x3d4   : > { %1418 = vmatmul.msk.bf16.gmra.mxu1 %vm592_vm0, %v1028_v33 }
 0x3d9   : > { %v1017_v34 = vpop.f32.mrf.mxu0 }
 0x3e1   : > { %v1019_v31 = vpop.f32.mrf.mxu0 }
 0x3e2   : > { %v1029_v35 = vpack.c.bf16 %v1019_v31, %v1017_v34 }
 0x3e4   : > { %1419 = vmatmul.msk.bf16.gmra.mxu1 %vm592_vm0, %v1029_v35 }
 0x3e9   : > { %v1022_v37 = vpop.f32.mrf.mxu0 }
 0x3f1   : > { %v1024_v38 = vpop.f32.mrf.mxu0 }
 0x3f2   : > { %v1030_v51 = vpack.c.bf16 %v1024_v38, %v1022_v37 }
 0x3f4   : > { %1420 = vmatmul.msk.bf16.gmra.mxu1 %vm592_vm0, %v1030_v51 }
 0x3f5   : > { %1558 = shalt.err (!%p1555_p3)
}
 0x3f6   : > { %s1627_s13 = smov 128   ;;  %s1628_s27 = smov 8  }
 0x3f7   : > { %1453 = dma.vmem_to_hbm [thread:$0]  (%p1717_p5), %s1162_s17, 1024, %s1164_s21, %s1142_s16, %s1627_s13, %s1627_s13, %s1628_s27  }
 0x3f8   : > { %s2091_s24 = scalar_lea.vmem [#allocation4], %s1928_s25  ;;  %s1179_s2 = sshll.u32 %s1175_s14, 4  ;;  %s1180_s2 = int_to_ptr.hbm [resolvable:$true] %s1179_s2 }
 0x3f9   : > { %s1177_s26 = sshll.u32 %s2091_s24, 4  ;;  %s1147_s3 = scalar_lea.sflag [#allocation5], %s1928_s25  ;;  %s1178_s26 = int_to_ptr.vmem [resolvable:$true] %s1177_s26 }
 0x3fa   : > { %s1573_s28 = sshra.s32 %s1180_s2, 4  ;;  %s1579_s22 = scalar_lea.hbm %s2076_s9, 2  ;;  %s1574_s28 = int_to_ptr.hbm [resolvable:$true] %s1573_s28 }
 0x3fb   : > { %s1575_s0 = scalar_lea.hbm %s1574_s28, 1  ;;  %p1580_p9 = scmp.lt.s32.totalorder %s1574_s28, %s2076_s9 }
 0x3fc   : > { %p1576_p4 = scmp.ne.s32.totalorder %s1574_s28, %s1575_s0  ;;  %p1581_p10 = scmp.lt.s32.totalorder %s1579_s22, %s1575_s0 }
 0x3fe   : > { %p1577_p7 = pnand %p1576_p4, %p1717_p5  ;;  %p1582_p11 = por %p1581_p10, %p1580_p9 }
 0x400   : > { %p1578_p8 = pneg %p1577_p7 }
 0x402   : > { %p1583_p12 = pnand %p1582_p11, %p1578_p8 }
 0x404   : > { %1586 = shalt.err (!%p1583_p12)
}
 0x405   : > { %1454 = dma.vmem_to_hbm [thread:$0]  (%p1717_p5), %s1178_s26, 16, %s1180_s2, %s1147_s3  }
 0x406   : > { %s1427_s25 = sshll.u32 %s1759_s29, 6 }
 0x407   : > { %s352_s17 = scalar_lea.vmem %s2074_s7, %s1427_s25 }
 0x441   : > { %v1068_v40 = vpop.f32.mrf.mxu1 }
 0x442   : > { %v1088_v42 = vadd.f32 %v1068_v40, %v1819_v52 }
 0x444   : > { %1096 = vst.msk [vmem:[%s352_s17] sm:$0xff] %vm592_vm0, %v1088_v42 }
 0x449   : > { %v1070_v43 = vpop.f32.mrf.mxu1 }
 0x44a   : > { %v1089_v44 = vadd.f32 %v1070_v43, %v1821_v53 }
 0x44c   : > { %1097 = vst.msk [vmem:[%s352_s17 + $0x8] sm:$0xff] %vm592_vm0, %v1089_v44 }
 0x451   : > { %v1073_v45 = vpop.f32.mrf.mxu1 }
 0x452   : > { %v1090_v47 = vadd.f32 %v1073_v45, %v1833_v63 }
 0x454   : > { %1098 = vst.msk [vmem:[%s352_s17 + $0x10] sm:$0xff] %vm592_vm0, %v1090_v47 }
 0x459   : > { %v1075_v48 = vpop.f32.mrf.mxu1 }
 0x45a   : > { %v1091_v36 = vadd.f32 %v1075_v48, %v1835_v0 }
 0x45c   : > { %1099 = vst.msk [vmem:[%s352_s17 + $0x18] sm:$0xff] %vm592_vm0, %v1091_v36 }
 0x461   : > { %v1078_v49 = vpop.f32.mrf.mxu1 }
 0x462   : > { %v1092_v52 = vadd.f32 %v1078_v49, %v1853_v12 }
 0x464   : > { %1100 = vst.msk [vmem:[%s352_s17 + $0x20] sm:$0xff] %vm592_vm0, %v1092_v52 }
 0x469   : > { %v1080_v58 = vpop.f32.mrf.mxu1 }
 0x46a   : > { %v1093_v53 = vadd.f32 %v1080_v58, %v1855_v13 }
 0x46c   : > { %1101 = vst.msk [vmem:[%s352_s17 + $0x28] sm:$0xff] %vm592_vm0, %v1093_v53 }
 0x471   : > { %v1083_v50 = vpop.f32.mrf.mxu1 }
 0x472   : > { %v1094_v63 = vadd.f32 %v1083_v50, %v1867_v23 }
 0x474   : > { %1102 = vst.msk [vmem:[%s352_s17 + $0x30] sm:$0xff] %vm592_vm0, %v1094_v63 }
 0x479   : > { %v1085_v54 = vpop.f32.mrf.mxu1 }
 0x47a   : > { %v1095_v0 = vadd.f32 %v1085_v54, %v1869_v24 }
 0x47c   : > { %1103 = vst.msk [vmem:[%s352_s17 + $0x38] sm:$0xff] %vm592_vm0, %v1095_v0 }
 0x47d PF: > { %p1464_p5 = scmp.ge.s32.totalorder %s1625_s12, 2  ;;  %s1199_s4 = sand.u32 1, %s1613_s30  }
 0x47e   : > { %s1200_s19 = scalar_lea.sflag [#allocation3], %s1199_s4 }
 0x47f   : > { %p1458_p13 = pnand %p1464_p5, %p1721_p6 }
 0x481   : > { %p1459_p0 = pneg %p1458_p13 }
 0x483   : > { %1604 = dma.done.wait (%p1459_p0), %s1200_s19, 1024  }
 0x484   : > { %1606 = vsyncadd (%p1459_p0), %s1200_s19, 4294966272  ;;  %s1210_s29 = scalar_lea.sflag [#allocation5], %s1199_s4 }
 0x485   : > { %1608 = dma.done.wait (%p1459_p0), %s1210_s29, 16  }
 0x486   : > { %1610 = vsyncadd (%p1459_p0), %s1210_s29, 4294967280  ;;  %s2092_s21 = sld [smem:[#allocation8_spill]]  ;;  %p23_p1 = scmp.ge.s32.totalorder %s1704_s15, 4  }
 0x487   : > { %s2093_s30 = smov %s1617_s10  ;;  %s2094_s10 = smov %s1621_s11 }
 0x488   : > { %s2096_s12 = smov %s1704_s15  ;;  %25 = sbr.rel (!%p23_p1) target bundleno = 11 (0xb), region = 112 }
 0x48c   : > { %s2095_s11 = smov %s2092_s21 }
 0x48d   :  { %1215 = vsyncpa [#allocation3], 1 }
 0x48e   :  { %1217 = vsyncpa [#allocation3 + $0x1], 1 }
 0x48f   :  { %1218 = vsyncpa [#allocation5], 1 }
 0x490   :  { %1220 = vsyncpa [#allocation5 + $0x1], 1 }

</bundles_post_ra>
